<compile_context>
chip_gen: v6e
topology: v6e:2x2x1
jax: 0.10.0
libtpu: 0.0.40
codegen_flags: <defaults>
</compile_context>

<pallas_src>
import functools

import jax
import jax.numpy as jnp
from jax.experimental import pallas as pl
from jax.experimental.pallas import tpu as pltpu


def _round_up(x, m):
    return ((x + m - 1) // m) * m


def lstm_recurrent_kernel(xp_ref, whh_ref, h_ref, c_sc, *,
                          hidden_size, t_chunk, seq_len, mask_tail, unroll):
    """One grid step = t_chunk LSTM timesteps for one batch block.

    Grid = (batch_blocks [parallel], time_chunks [arbitrary]).
    h state lives directly in the resident output ref; c state lives in VMEM scratch.
    """
    ci = pl.program_id(1)   # time-chunk index; resets to 0 at the start of each batch block

    @pl.when(ci == 0)
    def _():
        h_ref[...] = jnp.zeros_like(h_ref)
        c_sc[...] = jnp.zeros_like(c_sc)

    H = hidden_size
    t_base = ci * t_chunk

    def step(j, carry):
        h, c = carry
        # x_t @ W_ih + b was precomputed (f32 stream); add the h-projection here
        # (bf16 MXU operands, f32 accumulation). W_hh is read from VMEM in place.
        gates = xp_ref[j] + jnp.dot(h.astype(jnp.bfloat16), whh_ref[...],
                                    preferred_element_type=jnp.float32)   # (Bb, 4H) f32
        # Gate order is [i, f, o, g] (permuted at parameter-prep time): one sigmoid over
        # a contiguous (Bb, 3H) slab + one tanh over (Bb, H). sigmoid via tanh -> 1 EUP op.
        sig = 0.5 * jnp.tanh(0.5 * gates[:, 0:3 * H]) + 0.5
        i_g = sig[:, 0 * H:1 * H]
        f_g = sig[:, 1 * H:2 * H]
        o_g = sig[:, 2 * H:3 * H]
        g_g = jnp.tanh(gates[:, 3 * H:4 * H])
        c_new = f_g * c + i_g * g_g
        h_new = o_g * jnp.tanh(c_new)
        if mask_tail:
            # Only the final time chunk can contain padded steps; keep state unchanged there.
            valid = (t_base + j) < seq_len
            h_new = jnp.where(valid, h_new, h)
            c_new = jnp.where(valid, c_new, c)
        return h_new, c_new

    h_f, c_f = jax.lax.fori_loop(0, t_chunk, step, (h_ref[...], c_sc[...]),
                                 unroll=unroll)
    h_ref[...] = h_f
    c_sc[...] = c_f


def simple_lstm_forward(x_ids, params, *, max_time_chunk=32):
    """x_ids: (B, T) int32 token ids. Returns (B, vocab) f32 logits == fc(h_T)."""
    emb_tbl = params["embedding"]          # (V, E)
    w_ih = params["w_ih"]                  # (E, 4H)  gate order [i, f, g, o]
    w_hh = params["w_hh"]                  # (H, 4H)
    b = params["b"]                        # (1, 4H)  (= b_ih + b_hh)
    fc_w = params["fc_w"]                  # (H, Vout)
    fc_b = params["fc_b"]                  # (1, Vout)

    B, T = x_ids.shape
    E = emb_tbl.shape[1]
    H = w_hh.shape[0]

    # --- Parameter prep: permute gate columns [i, f, g, o] -> [i, f, o, g] so the kernel
    #     applies one sigmoid to a contiguous (B, 3H) slab and one tanh to (B, H).
    def perm_gates(w):
        return jnp.concatenate(
            [w[:, 0 * H:2 * H], w[:, 3 * H:4 * H], w[:, 2 * H:3 * H]], axis=1)

    w_ih_p, w_hh_p, b_p = perm_gates(w_ih), perm_gates(w_hh), perm_gates(b)

    # --- Batch padding / blocking. The batch-block grid axis is "parallel" so it shards
    #     across TensorCores on v7x (one block per core when batch is big enough).
    Bp = _round_up(max(B, 8), 8)
    if Bp >= 16:
        Bb = _round_up((Bp + 1) // 2, 8)
        Bp = _round_up(Bp, Bb)
    else:
        Bb = Bp
    num_b_blocks = Bp // Bb

    # --- Robust time chunking: never collapse to 1 step per grid iteration for awkward T.
    t_chunk = max(1, min(T, max_time_chunk))
    # Shrink t_chunk if the double-buffered f32 x_proj stream alone would blow a
    # v7x-safe VMEM budget (irrelevant for small configs, protects big ones).
    while 2 * t_chunk * Bb * 4 * H * 4 > (32 << 20) and t_chunk > 8:
        t_chunk //= 2
    num_chunks = pl.cdiv(T, t_chunk)
    Tp = num_chunks * t_chunk
    mask_tail = (Tp != T)

    # --- Time-major gather (transpose only the tiny int32 id matrix) + hoisted input
    #     projection as one big MXU-friendly matmul (bf16 operands, f32 accumulation).
    ids_tm = x_ids.T                                            # (T, B)
    emb_tm = jnp.take(emb_tbl, ids_tm, axis=0)                  # (T, B, E)
    emb_tm = jnp.pad(emb_tm, ((0, 0), (0, Bp - B), (0, 0)))     # (T, Bp, E)
    x_proj = jnp.dot(emb_tm.reshape(T * Bp, E).astype(jnp.bfloat16),
                     w_ih_p.astype(jnp.bfloat16),
                     preferred_element_type=jnp.float32)
    x_proj = x_proj.reshape(T, Bp, 4 * H) + b_p                 # bias added in f32
    x_proj = jnp.pad(x_proj, ((0, Tp - T), (0, 0), (0, 0)))     # pad time to chunk multiple

    # --- VMEM budget: x_proj double buffer + single-buffered W_hh + resident output +
    #     c scratch, 2x headroom, capped at 40 MiB (safe inside v7x's 64 MiB per-TC VMEM).
    need = (2 * t_chunk * Bb * 4 * H * 4        # x_proj stream (f32, double-buffered)
            + 1 * H * 4 * H * 2                 # W_hh (bf16, single-buffered)
            + 2 * Bb * H * 4                    # resident h / output
            + Bb * H * 4)                       # c scratch
    vmem_limit = int(min(max(2 * need + (4 << 20), 16 << 20), 40 << 20))

    kernel = functools.partial(lstm_recurrent_kernel,
                               hidden_size=H, t_chunk=t_chunk, seq_len=T,
                               mask_tail=mask_tail, unroll=min(t_chunk, 8))

    h_last = pl.pallas_call(
        kernel,
        out_shape=jax.ShapeDtypeStruct((Bp, H), jnp.float32),
        grid_spec=pltpu.PrefetchScalarGridSpec(
            num_scalar_prefetch=0,
            grid=(num_b_blocks, num_chunks),
            in_specs=[
                # x_proj chunk for this (batch block, time chunk): f32, time-major.
                pl.BlockSpec((t_chunk, Bb, 4 * H), lambda bb, c: (c, bb, 0)),
                # W_hh: constant block index -> resident; single-buffered (invariant weight).
                pl.BlockSpec((H, 4 * H), lambda bb, c: (0, 0),
                             pipeline_mode=pl.Buffered(1)),
            ],
            # h_T for this batch block; resident across the time axis (accumulator).
            out_specs=pl.BlockSpec((Bb, H), lambda bb, c: (bb, 0)),
            scratch_shapes=[pltpu.VMEM((Bb, H), jnp.float32)],   # c state
        ),
        compiler_params=pltpu.CompilerParams(
            dimension_semantics=("parallel", "arbitrary"),
            vmem_limit_bytes=vmem_limit,
        ),
    )(x_proj, w_hh_p.astype(jnp.bfloat16))

    h_last = h_last[:B]                                          # drop batch padding

    # Final FC externalized: keeps the (H, vocab) weight out of VMEM and lets XLA
    # parallelize it instead of serializing it at the tail of the recurrent grid.
    # TODO(synk): for very large 4H the input projection could be fused into the kernel
    # (resident W_ih + emb-chunk matmul) to avoid the x_proj HBM round-trip.
    logits = (jnp.dot(h_last.astype(jnp.bfloat16), fc_w.astype(jnp.bfloat16),
                      preferred_element_type=jnp.float32) + fc_b)
    return logits


def reference_forward(x_ids, params):
    """Pure-JAX f32 reference (mirrors PyTorch nn.LSTM semantics, gate order i,f,g,o)."""
    emb = jnp.take(params["embedding"], x_ids, axis=0)  # (B, T, E)
    B, T, E = emb.shape
    H = params["w_hh"].shape[0]
    h = jnp.zeros((B, H), jnp.float32)
    c = jnp.zeros((B, H), jnp.float32)
    for t in range(T):
        gates = emb[:, t, :] @ params["w_ih"] + h @ params["w_hh"] + params["b"]
        i_g = jax.nn.sigmoid(gates[:, 0 * H:1 * H])
        f_g = jax.nn.sigmoid(gates[:, 1 * H:2 * H])
        g_g = jnp.tanh(gates[:, 2 * H:3 * H])
        o_g = jax.nn.sigmoid(gates[:, 3 * H:4 * H])
        c = f_g * c + i_g * g_g
        h = o_g * jnp.tanh(c)
    return h @ params["fc_w"] + params["fc_b"]


def init_params(key, vocab_size, embed_size, hidden_size):
    ks = jax.random.split(key, 6)
    scale = 0.1
    return {
        "embedding": scale * jax.random.normal(ks[0], (vocab_size, embed_size), jnp.float32),
        "w_ih": scale * jax.random.normal(ks[1], (embed_size, 4 * hidden_size), jnp.float32),
        "w_hh": scale * jax.random.normal(ks[2], (hidden_size, 4 * hidden_size), jnp.float32),
        "b": scale * jax.random.normal(ks[3], (1, 4 * hidden_size), jnp.float32),
        "fc_w": scale * jax.random.normal(ks[4], (hidden_size, vocab_size), jnp.float32),
        "fc_b": scale * jax.random.normal(ks[5], (1, vocab_size), jnp.float32),
    }


if __name__ == "__main__":
    vocab_size, embed_size, hidden_size = 32, 16, 32
    batch, seq = 2, 8

    key = jax.random.PRNGKey(0)
    pkey, xkey = jax.random.split(key)
    params = init_params(pkey, vocab_size, embed_size, hidden_size)
    x_ids = jax.random.randint(xkey, (batch, seq), 0, vocab_size, dtype=jnp.int32)

    out = simple_lstm_forward(x_ids, params)
    out = jax.block_until_ready(out)
    ref = reference_forward(x_ids, params)
    assert out.shape == (batch, vocab_size)
    # bf16 matmul operands (f32 accumulation) vs pure-f32 reference -> loose tolerance.
    assert jnp.allclose(out, ref, atol=2e-2, rtol=2e-2), "mismatch vs reference"

    # Awkward (non-divisible) sequence length: exercises time padding + tail masking.
    x_ids2 = jax.random.randint(jax.random.PRNGKey(1), (batch, 35), 0, vocab_size,
                                dtype=jnp.int32)
    out2 = jax.block_until_ready(simple_lstm_forward(x_ids2, params))
    ref2 = reference_forward(x_ids2, params)
    assert jnp.allclose(out2, ref2, atol=2e-2, rtol=2e-2), "mismatch vs reference (T=35)"

    print("KERNEL_OK")
</pallas_src>

<mosaic_0001>
module attributes {stable_mosaic.version = 11 : i64} {
  func.func @lstm_recurrent_kernel(%arg0: i32, %arg1: i32, %arg2: memref<8x8x128xf32, #tpu.memory_space<vmem>>, %arg3: memref<32x128xbf16, #tpu.memory_space<vmem>>, %arg4: memref<8x32xf32, #tpu.memory_space<vmem>>, %arg5: memref<8x32xf32, #tpu.memory_space<vmem>>) attributes {dimension_semantics = [#tpu.dimension_semantics<parallel>, #tpu.dimension_semantics<arbitrary>], iteration_bounds = array<i64: 1, 1>, scalar_prefetch = 0 : i64, scratch_operands = 1 : i64, tpu.core_type = #tpu.core_type<tc>, window_params = [{transform_indices = @transform_0, window_bounds = array<i64: 8, 8, 128>}, {pipeline_mode = #tpu.pipeline_mode<synchronous>, transform_indices = @transform_1, window_bounds = array<i64: 32, 128>}, {transform_indices = @transform_2, window_bounds = array<i64: 8, 32>}]} {
    %c0_i32 = arith.constant 0 : i32
    %0 = arith.cmpi eq, %arg1, %c0_i32 : i32
    %1 = arith.extui %0 : i1 to i32
    %c0_i32_0 = arith.constant 0 : i32
    %2 = arith.cmpi ne, %1, %c0_i32_0 : i32
    scf.if %2 {
      %cst_72 = arith.constant 0.000000e+00 : f32
      %207 = vector.broadcast %cst_72 : f32 to vector<8x32xf32>
      %c0_73 = arith.constant 0 : index
      %c0_74 = arith.constant 0 : index
      %208 = vector.load %arg4[%c0_73, %c0_74] : memref<8x32xf32, #tpu.memory_space<vmem>>, vector<8x32xf32>
      tpu.vector_store %arg4[%c0_73, %c0_74], %207 {strides = array<i32>} : memref<8x32xf32, #tpu.memory_space<vmem>>, vector<8x32xf32>,
      %cst_75 = arith.constant 0.000000e+00 : f32
      %209 = vector.broadcast %cst_75 : f32 to vector<8x32xf32>
      %c0_76 = arith.constant 0 : index
      %c0_77 = arith.constant 0 : index
      %210 = vector.load %arg5[%c0_76, %c0_77] : memref<8x32xf32, #tpu.memory_space<vmem>>, vector<8x32xf32>
      tpu.vector_store %arg5[%c0_76, %c0_77], %209 {strides = array<i32>} : memref<8x32xf32, #tpu.memory_space<vmem>>, vector<8x32xf32>,
    } else {
    }
    %c0 = arith.constant 0 : index
    %c0_1 = arith.constant 0 : index
    %3 = vector.load %arg4[%c0, %c0_1] : memref<8x32xf32, #tpu.memory_space<vmem>>, vector<8x32xf32>
    %c0_2 = arith.constant 0 : index
    %c0_3 = arith.constant 0 : index
    %4 = vector.load %arg5[%c0_2, %c0_3] : memref<8x32xf32, #tpu.memory_space<vmem>>, vector<8x32xf32>
    %c0_i32_4 = arith.constant 0 : i32
    %5 = arith.index_cast %c0_i32_4 : i32 to index
    %c0_5 = arith.constant 0 : index
    %c0_6 = arith.constant 0 : index
    %6 = vector.load %arg2[%5, %c0_5, %c0_6] : memref<8x8x128xf32, #tpu.memory_space<vmem>>, vector<1x8x128xf32>
    %7 = vector.shape_cast %6 : vector<1x8x128xf32> to vector<8x128xf32>
    %8 = arith.truncf %3 : vector<8x32xf32> to vector<8x32xbf16>
    %c0_7 = arith.constant 0 : index
    %c0_8 = arith.constant 0 : index
    %9 = vector.load %arg3[%c0_7, %c0_8] : memref<32x128xbf16, #tpu.memory_space<vmem>>, vector<32x128xbf16>
    %cst = arith.constant dense<0.000000e+00> : vector<8x128xf32>
    %10 = tpu.matmul %8, %9, %cst {dimension_numbers = #tpu.dot_dimension_numbers<[1], [0], [0], [1], [0, 0, 1, 1], [], []>} : vector<8x32xbf16>, vector<32x128xbf16>, vector<8x128xf32> -> vector<8x128xf32>
    %11 = arith.addf %7, %10 : vector<8x128xf32>
    %12 = vector.extract_strided_slice %11 {offsets = [0, 0], sizes = [8, 96], strides = [1, 1]} : vector<8x128xf32> to vector<8x96xf32>
    %cst_9 = arith.constant 5.000000e-01 : f32
    %13 = vector.broadcast %cst_9 : f32 to vector<8x96xf32>
    %14 = arith.mulf %13, %12 : vector<8x96xf32>
    %15 = math.tanh %14 : vector<8x96xf32>
    %cst_10 = arith.constant 5.000000e-01 : f32
    %16 = vector.broadcast %cst_10 : f32 to vector<8x96xf32>
    %17 = arith.mulf %16, %15 : vector<8x96xf32>
    %cst_11 = arith.constant 5.000000e-01 : f32
    %18 = vector.broadcast %cst_11 : f32 to vector<8x96xf32>
    %19 = arith.addf %17, %18 : vector<8x96xf32>
    %20 = vector.extract_strided_slice %19 {offsets = [0, 0], sizes = [8, 32], strides = [1, 1]} : vector<8x96xf32> to vector<8x32xf32>
    %21 = vector.extract_strided_slice %19 {offsets = [0, 32], sizes = [8, 32], strides = [1, 1]} : vector<8x96xf32> to vector<8x32xf32>
    %22 = vector.extract_strided_slice %19 {offsets = [0, 64], sizes = [8, 32], strides = [1, 1]} : vector<8x96xf32> to vector<8x32xf32>
    %23 = vector.extract_strided_slice %11 {offsets = [0, 96], sizes = [8, 32], strides = [1, 1]} : vector<8x128xf32> to vector<8x32xf32>
    %24 = math.tanh %23 : vector<8x32xf32>
    %25 = arith.mulf %21, %4 : vector<8x32xf32>
    %26 = arith.mulf %20, %24 : vector<8x32xf32>
    %27 = arith.addf %25, %26 : vector<8x32xf32>
    %28 = math.tanh %27 : vector<8x32xf32>
    %29 = arith.mulf %22, %28 : vector<8x32xf32>
    %c1_i32 = arith.constant 1 : i32
    %30 = arith.index_cast %c1_i32 : i32 to index
    %c0_12 = arith.constant 0 : index
    %c0_13 = arith.constant 0 : index
    %31 = vector.load %arg2[%30, %c0_12, %c0_13] : memref<8x8x128xf32, #tpu.memory_space<vmem>>, vector<1x8x128xf32>
    %32 = vector.shape_cast %31 : vector<1x8x128xf32> to vector<8x128xf32>
    %33 = arith.truncf %29 : vector<8x32xf32> to vector<8x32xbf16>
    %c0_14 = arith.constant 0 : index
    %c0_15 = arith.constant 0 : index
    %34 = vector.load %arg3[%c0_14, %c0_15] : memref<32x128xbf16, #tpu.memory_space<vmem>>, vector<32x128xbf16>
    %cst_16 = arith.constant dense<0.000000e+00> : vector<8x128xf32>
    %35 = tpu.matmul %33, %34, %cst_16 {dimension_numbers = #tpu.dot_dimension_numbers<[1], [0], [0], [1], [0, 0, 1, 1], [], []>} : vector<8x32xbf16>, vector<32x128xbf16>, vector<8x128xf32> -> vector<8x128xf32>
    %36 = arith.addf %32, %35 : vector<8x128xf32>
    %37 = vector.extract_strided_slice %36 {offsets = [0, 0], sizes = [8, 96], strides = [1, 1]} : vector<8x128xf32> to vector<8x96xf32>
    %cst_17 = arith.constant 5.000000e-01 : f32
    %38 = vector.broadcast %cst_17 : f32 to vector<8x96xf32>
    %39 = arith.mulf %38, %37 : vector<8x96xf32>
    %40 = math.tanh %39 : vector<8x96xf32>
    %cst_18 = arith.constant 5.000000e-01 : f32
    %41 = vector.broadcast %cst_18 : f32 to vector<8x96xf32>
    %42 = arith.mulf %41, %40 : vector<8x96xf32>
    %cst_19 = arith.constant 5.000000e-01 : f32
    %43 = vector.broadcast %cst_19 : f32 to vector<8x96xf32>
    %44 = arith.addf %42, %43 : vector<8x96xf32>
    %45 = vector.extract_strided_slice %44 {offsets = [0, 0], sizes = [8, 32], strides = [1, 1]} : vector<8x96xf32> to vector<8x32xf32>
    %46 = vector.extract_strided_slice %44 {offsets = [0, 32], sizes = [8, 32], strides = [1, 1]} : vector<8x96xf32> to vector<8x32xf32>
    %47 = vector.extract_strided_slice %44 {offsets = [0, 64], sizes = [8, 32], strides = [1, 1]} : vector<8x96xf32> to vector<8x32xf32>
    %48 = vector.extract_strided_slice %36 {offsets = [0, 96], sizes = [8, 32], strides = [1, 1]} : vector<8x128xf32> to vector<8x32xf32>
    %49 = math.tanh %48 : vector<8x32xf32>
    %50 = arith.mulf %46, %27 : vector<8x32xf32>
    %51 = arith.mulf %45, %49 : vector<8x32xf32>
    %52 = arith.addf %50, %51 : vector<8x32xf32>
    %53 = math.tanh %52 : vector<8x32xf32>
    %54 = arith.mulf %47, %53 : vector<8x32xf32>
    %c2_i32 = arith.constant 2 : i32
    %55 = arith.index_cast %c2_i32 : i32 to index
    %c0_20 = arith.constant 0 : index
    %c0_21 = arith.constant 0 : index
    %56 = vector.load %arg2[%55, %c0_20, %c0_21] : memref<8x8x128xf32, #tpu.memory_space<vmem>>, vector<1x8x128xf32>
    %57 = vector.shape_cast %56 : vector<1x8x128xf32> to vector<8x128xf32>
    %58 = arith.truncf %54 : vector<8x32xf32> to vector<8x32xbf16>
    %c0_22 = arith.constant 0 : index
    %c0_23 = arith.constant 0 : index
    %59 = vector.load %arg3[%c0_22, %c0_23] : memref<32x128xbf16, #tpu.memory_space<vmem>>, vector<32x128xbf16>
    %cst_24 = arith.constant dense<0.000000e+00> : vector<8x128xf32>
    %60 = tpu.matmul %58, %59, %cst_24 {dimension_numbers = #tpu.dot_dimension_numbers<[1], [0], [0], [1], [0, 0, 1, 1], [], []>} : vector<8x32xbf16>, vector<32x128xbf16>, vector<8x128xf32> -> vector<8x128xf32>
    %61 = arith.addf %57, %60 : vector<8x128xf32>
    %62 = vector.extract_strided_slice %61 {offsets = [0, 0], sizes = [8, 96], strides = [1, 1]} : vector<8x128xf32> to vector<8x96xf32>
    %cst_25 = arith.constant 5.000000e-01 : f32
    %63 = vector.broadcast %cst_25 : f32 to vector<8x96xf32>
    %64 = arith.mulf %63, %62 : vector<8x96xf32>
    %65 = math.tanh %64 : vector<8x96xf32>
    %cst_26 = arith.constant 5.000000e-01 : f32
    %66 = vector.broadcast %cst_26 : f32 to vector<8x96xf32>
    %67 = arith.mulf %66, %65 : vector<8x96xf32>
    %cst_27 = arith.constant 5.000000e-01 : f32
    %68 = vector.broadcast %cst_27 : f32 to vector<8x96xf32>
    %69 = arith.addf %67, %68 : vector<8x96xf32>
    %70 = vector.extract_strided_slice %69 {offsets = [0, 0], sizes = [8, 32], strides = [1, 1]} : vector<8x96xf32> to vector<8x32xf32>
    %71 = vector.extract_strided_slice %69 {offsets = [0, 32], sizes = [8, 32], strides = [1, 1]} : vector<8x96xf32> to vector<8x32xf32>
    %72 = vector.extract_strided_slice %69 {offsets = [0, 64], sizes = [8, 32], strides = [1, 1]} : vector<8x96xf32> to vector<8x32xf32>
    %73 = vector.extract_strided_slice %61 {offsets = [0, 96], sizes = [8, 32], strides = [1, 1]} : vector<8x128xf32> to vector<8x32xf32>
    %74 = math.tanh %73 : vector<8x32xf32>
    %75 = arith.mulf %71, %52 : vector<8x32xf32>
    %76 = arith.mulf %70, %74 : vector<8x32xf32>
    %77 = arith.addf %75, %76 : vector<8x32xf32>
    %78 = math.tanh %77 : vector<8x32xf32>
    %79 = arith.mulf %72, %78 : vector<8x32xf32>
    %c3_i32 = arith.constant 3 : i32
    %80 = arith.index_cast %c3_i32 : i32 to index
    %c0_28 = arith.constant 0 : index
    %c0_29 = arith.constant 0 : index
    %81 = vector.load %arg2[%80, %c0_28, %c0_29] : memref<8x8x128xf32, #tpu.memory_space<vmem>>, vector<1x8x128xf32>
    %82 = vector.shape_cast %81 : vector<1x8x128xf32> to vector<8x128xf32>
    %83 = arith.truncf %79 : vector<8x32xf32> to vector<8x32xbf16>
    %c0_30 = arith.constant 0 : index
    %c0_31 = arith.constant 0 : index
    %84 = vector.load %arg3[%c0_30, %c0_31] : memref<32x128xbf16, #tpu.memory_space<vmem>>, vector<32x128xbf16>
    %cst_32 = arith.constant dense<0.000000e+00> : vector<8x128xf32>
    %85 = tpu.matmul %83, %84, %cst_32 {dimension_numbers = #tpu.dot_dimension_numbers<[1], [0], [0], [1], [0, 0, 1, 1], [], []>} : vector<8x32xbf16>, vector<32x128xbf16>, vector<8x128xf32> -> vector<8x128xf32>
    %86 = arith.addf %82, %85 : vector<8x128xf32>
    %87 = vector.extract_strided_slice %86 {offsets = [0, 0], sizes = [8, 96], strides = [1, 1]} : vector<8x128xf32> to vector<8x96xf32>
    %cst_33 = arith.constant 5.000000e-01 : f32
    %88 = vector.broadcast %cst_33 : f32 to vector<8x96xf32>
    %89 = arith.mulf %88, %87 : vector<8x96xf32>
    %90 = math.tanh %89 : vector<8x96xf32>
    %cst_34 = arith.constant 5.000000e-01 : f32
    %91 = vector.broadcast %cst_34 : f32 to vector<8x96xf32>
    %92 = arith.mulf %91, %90 : vector<8x96xf32>
    %cst_35 = arith.constant 5.000000e-01 : f32
    %93 = vector.broadcast %cst_35 : f32 to vector<8x96xf32>
    %94 = arith.addf %92, %93 : vector<8x96xf32>
    %95 = vector.extract_strided_slice %94 {offsets = [0, 0], sizes = [8, 32], strides = [1, 1]} : vector<8x96xf32> to vector<8x32xf32>
    %96 = vector.extract_strided_slice %94 {offsets = [0, 32], sizes = [8, 32], strides = [1, 1]} : vector<8x96xf32> to vector<8x32xf32>
    %97 = vector.extract_strided_slice %94 {offsets = [0, 64], sizes = [8, 32], strides = [1, 1]} : vector<8x96xf32> to vector<8x32xf32>
    %98 = vector.extract_strided_slice %86 {offsets = [0, 96], sizes = [8, 32], strides = [1, 1]} : vector<8x128xf32> to vector<8x32xf32>
    %99 = math.tanh %98 : vector<8x32xf32>
    %100 = arith.mulf %96, %77 : vector<8x32xf32>
    %101 = arith.mulf %95, %99 : vector<8x32xf32>
    %102 = arith.addf %100, %101 : vector<8x32xf32>
    %103 = math.tanh %102 : vector<8x32xf32>
    %104 = arith.mulf %97, %103 : vector<8x32xf32>
    %c4_i32 = arith.constant 4 : i32
    %105 = arith.index_cast %c4_i32 : i32 to index
    %c0_36 = arith.constant 0 : index
    %c0_37 = arith.constant 0 : index
    %106 = vector.load %arg2[%105, %c0_36, %c0_37] : memref<8x8x128xf32, #tpu.memory_space<vmem>>, vector<1x8x128xf32>
    %107 = vector.shape_cast %106 : vector<1x8x128xf32> to vector<8x128xf32>
    %108 = arith.truncf %104 : vector<8x32xf32> to vector<8x32xbf16>
    %c0_38 = arith.constant 0 : index
    %c0_39 = arith.constant 0 : index
    %109 = vector.load %arg3[%c0_38, %c0_39] : memref<32x128xbf16, #tpu.memory_space<vmem>>, vector<32x128xbf16>
    %cst_40 = arith.constant dense<0.000000e+00> : vector<8x128xf32>
    %110 = tpu.matmul %108, %109, %cst_40 {dimension_numbers = #tpu.dot_dimension_numbers<[1], [0], [0], [1], [0, 0, 1, 1], [], []>} : vector<8x32xbf16>, vector<32x128xbf16>, vector<8x128xf32> -> vector<8x128xf32>
    %111 = arith.addf %107, %110 : vector<8x128xf32>
    %112 = vector.extract_strided_slice %111 {offsets = [0, 0], sizes = [8, 96], strides = [1, 1]} : vector<8x128xf32> to vector<8x96xf32>
    %cst_41 = arith.constant 5.000000e-01 : f32
    %113 = vector.broadcast %cst_41 : f32 to vector<8x96xf32>
    %114 = arith.mulf %113, %112 : vector<8x96xf32>
    %115 = math.tanh %114 : vector<8x96xf32>
    %cst_42 = arith.constant 5.000000e-01 : f32
    %116 = vector.broadcast %cst_42 : f32 to vector<8x96xf32>
    %117 = arith.mulf %116, %115 : vector<8x96xf32>
    %cst_43 = arith.constant 5.000000e-01 : f32
    %118 = vector.broadcast %cst_43 : f32 to vector<8x96xf32>
    %119 = arith.addf %117, %118 : vector<8x96xf32>
    %120 = vector.extract_strided_slice %119 {offsets = [0, 0], sizes = [8, 32], strides = [1, 1]} : vector<8x96xf32> to vector<8x32xf32>
    %121 = vector.extract_strided_slice %119 {offsets = [0, 32], sizes = [8, 32], strides = [1, 1]} : vector<8x96xf32> to vector<8x32xf32>
    %122 = vector.extract_strided_slice %119 {offsets = [0, 64], sizes = [8, 32], strides = [1, 1]} : vector<8x96xf32> to vector<8x32xf32>
    %123 = vector.extract_strided_slice %111 {offsets = [0, 96], sizes = [8, 32], strides = [1, 1]} : vector<8x128xf32> to vector<8x32xf32>
    %124 = math.tanh %123 : vector<8x32xf32>
    %125 = arith.mulf %121, %102 : vector<8x32xf32>
    %126 = arith.mulf %120, %124 : vector<8x32xf32>
    %127 = arith.addf %125, %126 : vector<8x32xf32>
    %128 = math.tanh %127 : vector<8x32xf32>
    %129 = arith.mulf %122, %128 : vector<8x32xf32>
    %c5_i32 = arith.constant 5 : i32
    %130 = arith.index_cast %c5_i32 : i32 to index
    %c0_44 = arith.constant 0 : index
    %c0_45 = arith.constant 0 : index
    %131 = vector.load %arg2[%130, %c0_44, %c0_45] : memref<8x8x128xf32, #tpu.memory_space<vmem>>, vector<1x8x128xf32>
    %132 = vector.shape_cast %131 : vector<1x8x128xf32> to vector<8x128xf32>
    %133 = arith.truncf %129 : vector<8x32xf32> to vector<8x32xbf16>
    %c0_46 = arith.constant 0 : index
    %c0_47 = arith.constant 0 : index
    %134 = vector.load %arg3[%c0_46, %c0_47] : memref<32x128xbf16, #tpu.memory_space<vmem>>, vector<32x128xbf16>
    %cst_48 = arith.constant dense<0.000000e+00> : vector<8x128xf32>
    %135 = tpu.matmul %133, %134, %cst_48 {dimension_numbers = #tpu.dot_dimension_numbers<[1], [0], [0], [1], [0, 0, 1, 1], [], []>} : vector<8x32xbf16>, vector<32x128xbf16>, vector<8x128xf32> -> vector<8x128xf32>
    %136 = arith.addf %132, %135 : vector<8x128xf32>
    %137 = vector.extract_strided_slice %136 {offsets = [0, 0], sizes = [8, 96], strides = [1, 1]} : vector<8x128xf32> to vector<8x96xf32>
    %cst_49 = arith.constant 5.000000e-01 : f32
    %138 = vector.broadcast %cst_49 : f32 to vector<8x96xf32>
    %139 = arith.mulf %138, %137 : vector<8x96xf32>
    %140 = math.tanh %139 : vector<8x96xf32>
    %cst_50 = arith.constant 5.000000e-01 : f32
    %141 = vector.broadcast %cst_50 : f32 to vector<8x96xf32>
    %142 = arith.mulf %141, %140 : vector<8x96xf32>
    %cst_51 = arith.constant 5.000000e-01 : f32
    %143 = vector.broadcast %cst_51 : f32 to vector<8x96xf32>
    %144 = arith.addf %142, %143 : vector<8x96xf32>
    %145 = vector.extract_strided_slice %144 {offsets = [0, 0], sizes = [8, 32], strides = [1, 1]} : vector<8x96xf32> to vector<8x32xf32>
    %146 = vector.extract_strided_slice %144 {offsets = [0, 32], sizes = [8, 32], strides = [1, 1]} : vector<8x96xf32> to vector<8x32xf32>
    %147 = vector.extract_strided_slice %144 {offsets = [0, 64], sizes = [8, 32], strides = [1, 1]} : vector<8x96xf32> to vector<8x32xf32>
    %148 = vector.extract_strided_slice %136 {offsets = [0, 96], sizes = [8, 32], strides = [1, 1]} : vector<8x128xf32> to vector<8x32xf32>
    %149 = math.tanh %148 : vector<8x32xf32>
    %150 = arith.mulf %146, %127 : vector<8x32xf32>
    %151 = arith.mulf %145, %149 : vector<8x32xf32>
    %152 = arith.addf %150, %151 : vector<8x32xf32>
    %153 = math.tanh %152 : vector<8x32xf32>
    %154 = arith.mulf %147, %153 : vector<8x32xf32>
    %c6_i32 = arith.constant 6 : i32
    %155 = arith.index_cast %c6_i32 : i32 to index
    %c0_52 = arith.constant 0 : index
    %c0_53 = arith.constant 0 : index
    %156 = vector.load %arg2[%155, %c0_52, %c0_53] : memref<8x8x128xf32, #tpu.memory_space<vmem>>, vector<1x8x128xf32>
    %157 = vector.shape_cast %156 : vector<1x8x128xf32> to vector<8x128xf32>
    %158 = arith.truncf %154 : vector<8x32xf32> to vector<8x32xbf16>
    %c0_54 = arith.constant 0 : index
    %c0_55 = arith.constant 0 : index
    %159 = vector.load %arg3[%c0_54, %c0_55] : memref<32x128xbf16, #tpu.memory_space<vmem>>, vector<32x128xbf16>
    %cst_56 = arith.constant dense<0.000000e+00> : vector<8x128xf32>
    %160 = tpu.matmul %158, %159, %cst_56 {dimension_numbers = #tpu.dot_dimension_numbers<[1], [0], [0], [1], [0, 0, 1, 1], [], []>} : vector<8x32xbf16>, vector<32x128xbf16>, vector<8x128xf32> -> vector<8x128xf32>
    %161 = arith.addf %157, %160 : vector<8x128xf32>
    %162 = vector.extract_strided_slice %161 {offsets = [0, 0], sizes = [8, 96], strides = [1, 1]} : vector<8x128xf32> to vector<8x96xf32>
    %cst_57 = arith.constant 5.000000e-01 : f32
    %163 = vector.broadcast %cst_57 : f32 to vector<8x96xf32>
    %164 = arith.mulf %163, %162 : vector<8x96xf32>
    %165 = math.tanh %164 : vector<8x96xf32>
    %cst_58 = arith.constant 5.000000e-01 : f32
    %166 = vector.broadcast %cst_58 : f32 to vector<8x96xf32>
    %167 = arith.mulf %166, %165 : vector<8x96xf32>
    %cst_59 = arith.constant 5.000000e-01 : f32
    %168 = vector.broadcast %cst_59 : f32 to vector<8x96xf32>
    %169 = arith.addf %167, %168 : vector<8x96xf32>
    %170 = vector.extract_strided_slice %169 {offsets = [0, 0], sizes = [8, 32], strides = [1, 1]} : vector<8x96xf32> to vector<8x32xf32>
    %171 = vector.extract_strided_slice %169 {offsets = [0, 32], sizes = [8, 32], strides = [1, 1]} : vector<8x96xf32> to vector<8x32xf32>
    %172 = vector.extract_strided_slice %169 {offsets = [0, 64], sizes = [8, 32], strides = [1, 1]} : vector<8x96xf32> to vector<8x32xf32>
    %173 = vector.extract_strided_slice %161 {offsets = [0, 96], sizes = [8, 32], strides = [1, 1]} : vector<8x128xf32> to vector<8x32xf32>
    %174 = math.tanh %173 : vector<8x32xf32>
    %175 = arith.mulf %171, %152 : vector<8x32xf32>
    %176 = arith.mulf %170, %174 : vector<8x32xf32>
    %177 = arith.addf %175, %176 : vector<8x32xf32>
    %178 = math.tanh %177 : vector<8x32xf32>
    %179 = arith.mulf %172, %178 : vector<8x32xf32>
    %c7_i32 = arith.constant 7 : i32
    %180 = arith.index_cast %c7_i32 : i32 to index
    %c0_60 = arith.constant 0 : index
    %c0_61 = arith.constant 0 : index
    %181 = vector.load %arg2[%180, %c0_60, %c0_61] : memref<8x8x128xf32, #tpu.memory_space<vmem>>, vector<1x8x128xf32>
    %182 = vector.shape_cast %181 : vector<1x8x128xf32> to vector<8x128xf32>
    %183 = arith.truncf %179 : vector<8x32xf32> to vector<8x32xbf16>
    %c0_62 = arith.constant 0 : index
    %c0_63 = arith.constant 0 : index
    %184 = vector.load %arg3[%c0_62, %c0_63] : memref<32x128xbf16, #tpu.memory_space<vmem>>, vector<32x128xbf16>
    %cst_64 = arith.constant dense<0.000000e+00> : vector<8x128xf32>
    %185 = tpu.matmul %183, %184, %cst_64 {dimension_numbers = #tpu.dot_dimension_numbers<[1], [0], [0], [1], [0, 0, 1, 1], [], []>} : vector<8x32xbf16>, vector<32x128xbf16>, vector<8x128xf32> -> vector<8x128xf32>
    %186 = arith.addf %182, %185 : vector<8x128xf32>
    %187 = vector.extract_strided_slice %186 {offsets = [0, 0], sizes = [8, 96], strides = [1, 1]} : vector<8x128xf32> to vector<8x96xf32>
    %cst_65 = arith.constant 5.000000e-01 : f32
    %188 = vector.broadcast %cst_65 : f32 to vector<8x96xf32>
    %189 = arith.mulf %188, %187 : vector<8x96xf32>
    %190 = math.tanh %189 : vector<8x96xf32>
    %cst_66 = arith.constant 5.000000e-01 : f32
    %191 = vector.broadcast %cst_66 : f32 to vector<8x96xf32>
    %192 = arith.mulf %191, %190 : vector<8x96xf32>
    %cst_67 = arith.constant 5.000000e-01 : f32
    %193 = vector.broadcast %cst_67 : f32 to vector<8x96xf32>
    %194 = arith.addf %192, %193 : vector<8x96xf32>
    %195 = vector.extract_strided_slice %194 {offsets = [0, 0], sizes = [8, 32], strides = [1, 1]} : vector<8x96xf32> to vector<8x32xf32>
    %196 = vector.extract_strided_slice %194 {offsets = [0, 32], sizes = [8, 32], strides = [1, 1]} : vector<8x96xf32> to vector<8x32xf32>
    %197 = vector.extract_strided_slice %194 {offsets = [0, 64], sizes = [8, 32], strides = [1, 1]} : vector<8x96xf32> to vector<8x32xf32>
    %198 = vector.extract_strided_slice %186 {offsets = [0, 96], sizes = [8, 32], strides = [1, 1]} : vector<8x128xf32> to vector<8x32xf32>
    %199 = math.tanh %198 : vector<8x32xf32>
    %200 = arith.mulf %196, %177 : vector<8x32xf32>
    %201 = arith.mulf %195, %199 : vector<8x32xf32>
    %202 = arith.addf %200, %201 : vector<8x32xf32>
    %203 = math.tanh %202 : vector<8x32xf32>
    %204 = arith.mulf %197, %203 : vector<8x32xf32>
    %c8_i32 = arith.constant 8 : i32
    %c0_68 = arith.constant 0 : index
    %c0_69 = arith.constant 0 : index
    %205 = vector.load %arg4[%c0_68, %c0_69] : memref<8x32xf32, #tpu.memory_space<vmem>>, vector<8x32xf32>
    tpu.vector_store %arg4[%c0_68, %c0_69], %204 {strides = array<i32>} : memref<8x32xf32, #tpu.memory_space<vmem>>, vector<8x32xf32>,
    %c0_70 = arith.constant 0 : index
    %c0_71 = arith.constant 0 : index
    %206 = vector.load %arg5[%c0_70, %c0_71] : memref<8x32xf32, #tpu.memory_space<vmem>>, vector<8x32xf32>
    tpu.vector_store %arg5[%c0_70, %c0_71], %202 {strides = array<i32>} : memref<8x32xf32, #tpu.memory_space<vmem>>, vector<8x32xf32>,
    return
  }
  func.func @transform_0(%arg0: i32, %arg1: i32) -> (i32, i32, i32) {
    %c0_i32 = arith.constant 0 : i32
    %c0_i32_0 = arith.constant 0 : i32
    return %arg1, %arg0, %c0_i32 : i32, i32, i32
  }
  func.func @transform_1(%arg0: i32, %arg1: i32) -> (i32, i32) {
    %c0_i32 = arith.constant 0 : i32
    %c0_i32_0 = arith.constant 0 : i32
    %c0_i32_1 = arith.constant 0 : i32
    return %c0_i32, %c0_i32_0 : i32, i32
  }
  func.func @transform_2(%arg0: i32, %arg1: i32) -> (i32, i32) {
    %c0_i32 = arith.constant 0 : i32
    %c0_i32_0 = arith.constant 0 : i32
    return %arg0, %c0_i32 : i32, i32
  }
}

</mosaic_0001>

<bundles_post_ra>
// kernel: tpu_custom_call.1
= control target key start
LH: loop header
LB: loop body
LE: loop exit
PB: predicated region body
PF: predicated region fallthrough
CT: control target
= control target key end

     0   :  { %7 = vsyncpa [#allocation4], 0  ;;  %s1030_s0 = inlined_call_operand.hbm [shape: f32[8,8,128], index: 0, kind: input, shape index: {}]   ;;  %s1031_s1 = inlined_call_operand.hbm [shape: bf16[32,128], index: 1, kind: input, shape index: {}]   ;;  %s1032_s2 = inlined_call_operand.hbm [shape: f32[8,32], index: 2, kind: output, shape index: {}]  }
   0x1   :  { %8 = vsyncpa [#allocation7], 0 }
   0x2   :  { %9 = vsyncpa [#allocation5], 0  ;;  %s894_s9 = smov [#allocation3]  }
   0x3   :  { %s15_s10 = sshll.u32 %s894_s9, 4  ;;  %s16_s10 = int_to_ptr.vmem [resolvable:$true] %s15_s10 }
   0x4   :  { %s836_s11 = scalar_lea.vmem %s16_s10, 1024  ;;  %p841_p1 = scmp.lt.s32.totalorder %s16_s10, %s16_s10 }
   0x5   :  { %p837_p0 = scmp.ne.s32.totalorder %s16_s10, %s836_s11  ;;  %p842_p2 = scmp.lt.s32.totalorder %s836_s11, %s836_s11 }
   0x7   :  { %p843_p3 = por %p842_p2, %p841_p1 }
   0x9   :  { %p844_p4 = pnand %p843_p3, %p837_p0 }
   0xb   :  { %847 = shalt.err (!%p844_p4)
}
   0xc   :  { %s895_s12 = smov 128   ;;  %s896_s13 = smov 8  }
   0xd   :  { %21 = dma.hbm_to_vmem [thread:$0]  %s1030_s0, 1024, %s16_s10, [#allocation4], %s895_s12, %s895_s12, %s896_s13  }
   0xe   :  { %s897_s16 = smov [#allocation6]  }
   0xf   :  { %s27_s17 = sshll.u32 %s897_s16, 4  ;;  %s28_s17 = int_to_ptr.vmem [resolvable:$true] %s27_s17 }
  0x10   :  { %s856_s18 = scalar_lea.vmem %s28_s17, 256  ;;  %p861_p6 = scmp.lt.s32.totalorder %s28_s17, %s28_s17 }
  0x11   :  { %p857_p5 = scmp.ne.s32.totalorder %s28_s17, %s856_s18  ;;  %p862_p7 = scmp.lt.s32.totalorder %s856_s18, %s856_s18 }
  0x13   :  { %p863_p8 = por %p862_p7, %p861_p6 }
  0x15   :  { %p864_p9 = pnand %p863_p8, %p857_p5 }
  0x17   :  { %867 = shalt.err (!%p864_p9)
}
  0x18   :  { %s898_s19 = smov 64   ;;  %s899_s20 = smov 4  }
  0x19   :  { %33 = dma.hbm_to_vmem [thread:$0]  %s1031_s1, 256, %s28_s17, [#allocation7], %s898_s19, %s898_s19, %s899_s20  }
  0x1a   :  { %888 = dma.done.wait [#allocation4], 1024  }
  0x1b   :  { %889 = vsyncadd [#allocation4], 4294966272 }
  0x1c   :  { %890 = dma.done.wait [#allocation7], 256  }
  0x1d   :  { %891 = vsyncadd [#allocation7], 4294967040  ;;  %vm45_vm0 = vcmask 261120   ;;  %v900_v0 = vmov 0.0   ;;  %vm901_vm1 = vmmov 0   ;;  %v938_v1 = vld [vmem:[#allocation6 + $0x8] sm:$0xff]  }
  0x1e   :  { %703 = vmatprep.subr.bf16.mxu0 %v900_v0  ;;  %707 = vmatprep.mubr.msk.bf16.mxu0 %vm901_vm1, %v900_v0  ;;  %46 = vst.msk [vmem:[#allocation8] sm:$0xff] %vm45_vm0, %v900_v0  ;;  %47 = vst.msk [vmem:[#allocation2] sm:$0xff] %vm45_vm0, %v900_v0  ;;  %v941_v2 = vld [vmem:[#allocation6] sm:$0xff]   ;;  %s902_s0 = smov 32   ;;  %v140_v28 = vld [vmem:[#allocation3 + $0x8] sm:$0xff]  ;;  %s903_s1 = smov 96  }
  0x1f   :  { %711 = vmatprep.subr.bf16.mxu1 %v900_v0  ;;  %715 = vmatprep.mubr.msk.bf16.mxu1 %vm901_vm1, %v900_v0  ;;  %v50_v5 = vld [vmem:[#allocation3] sm:$0xff]  ;;  %v212_v49 = vld [vmem:[#allocation3 + $0x10] sm:$0xff]  ;;  %s904_s23 = smov [#allocation8]  }
  0x20   :  { %704 = vmatpush3.bf16.msra.mxu0 %v938_v1  ;;  %712 = vmatpush3.bf16.msra.mxu1 %v938_v1  ;;  %s659_s24 = sshll.u32 %s904_s23, 4  ;;  %s660_s24 = int_to_ptr.vmem [resolvable:$true] %s659_s24 }
  0x21   :  { %705 = vmatprep.subr.bf16.mxu0 %v900_v0  ;;  %713 = vmatprep.subr.bf16.mxu1 %v900_v0  ;;  %s868_s25 = scalar_lea.vmem %s660_s24, 128  ;;  %p873_p11 = scmp.lt.s32.totalorder %s660_s24, %s660_s24 }
  0x22   :  { %p869_p10 = scmp.ne.s32.totalorder %s660_s24, %s868_s25  ;;  %p874_p12 = scmp.lt.s32.totalorder %s868_s25, %s868_s25 }
  0x24   :  { %706 = vmatpush3.bf16.msra.mxu0 %v941_v2  ;;  %714 = vmatpush3.bf16.msra.mxu1 %v941_v2  ;;  %p875_p13 = por %p874_p12, %p873_p11 }
  0x25   :  { %v48_v3 = vld [vmem:[#allocation8] sm:$0xff]  ;;  %719 = vmatprep.subr.bf16.mxu0 %v900_v0  ;;  %727 = vmatprep.subr.bf16.mxu1 %v900_v0  ;;  %v49_v12 = vld [vmem:[#allocation2] sm:$0xff] }
  0x26   :  { %v51_v4 = vpack.c.bf16 %v48_v3, %v48_v3  ;;  %p876_p0 = pnand %p875_p13, %p869_p10 }
  0x28   :  { %708 = vmatmul.mubr.msk.bf16.vlgmr.msra.gmra.mxu0 %vm45_vm0, %v51_v4 }
  0x29   :  { %720 = vmatpush3.bf16.msra.mxu0 %v938_v1  ;;  %723 = vmatprep.mubr.msk.bf16.mxu0 %vm901_vm1, %v900_v0 }
  0x2a   :  { %721 = vmatprep.subr.bf16.mxu0 %v900_v0 }
  0x2d   :  { %722 = vmatpush3.bf16.msra.mxu0 %v941_v2 }
  0x2e   :  { %735 = vmatprep.subr.bf16.mxu0 %v900_v0 }
  0xe8   :  { %v106_v6 = vpop.f32.mrf.mxu0 }
  0xe9   :  { %v112_v7 = vadd.f32 %v106_v6, %v50_v5 }
  0xea   :  { %v709_v8 = vpop.f32.mrf.mxu0 }
  0xeb   :  { %780 = vtanh.f32 %v112_v7  ;;  %v113_v13 = vmul.f32 0.5, %v112_v7 }
  0xec   :  { %v109_v9 = vpop.f32.mrf.mxu0 }
  0xed   :  { %782 = vtanh.f32 %v113_v13  ;;  %v284_v9 = vld [vmem:[#allocation3 + $0x18] sm:$0xff] }
  0xee   :  { %v710_v10 = vpop.f32.mrf.mxu0 }
  0xf8   :  { %v781_v11 = vpop.eup %780 }
  0xf9   :  { %124 = vrot.lane.b32.xlu0 %v781_v11, %s902_s0 }
  0xfa   :  { %v783_v14 = vpop.eup %782 }
  0xfb   :  { %v115_v15 = vmul.f32 0.5, %v783_v14 }
  0xfd   :  { %119 = vrot.lane.b32.xlu0 %v49_v12, %s902_s0  ;;  %v116_v16 = vadd.f32 0.5, %v115_v15 }
 0x16b   :  { %v125_v17 = vpop.permute.xlu0 %124 }
 0x16c   :  { %v127_v18 = vmul.f32 %v125_v17, %v116_v16 }
 0x16e   :  { %129 = vrot.lane.b32.xlu1 %v127_v18, %s902_s0 }
 0x16f   :  { %v120_v19 = vpop.permute.xlu0 %119 }
 0x170   :  { %v122_v20 = vmul.f32 %v120_v19, %v116_v16 }
 0x1e0   :  { %v130_v21 = vpop.permute.xlu1 %129 }
 0x1e1   :  { %v132_v22 = vadd.f32 %v130_v21, %v122_v20 }
 0x1e3   :  { %784 = vtanh.f32 %v132_v22 }
 0x1f0   :  { %v785_v23 = vpop.eup %784 }
 0x1f1   :  { %135 = vrot.lane.b32.xlu1 %v785_v23, %s902_s0 }
 0x263   :  { %v136_v24 = vpop.permute.xlu1 %135 }
 0x264   :  { %v138_v25 = vmul.f32 %v136_v24, %v116_v16 }
 0x266   :  { %v141_v26 = vpack.c.bf16 %v138_v25, %v138_v25 }
 0x268   :  { %143 = vrot.lane.b32.xlu0 %v141_v26, %s898_s19 }
 0x2da   :  { %v144_v27 = vpop.permute.xlu0 %143 }
 0x2db   :  { %716 = vmatmul.mubr.msk.bf16.vlgmr.msra.gmra.mxu1 %vm45_vm0, %v144_v27 }
 0x2dc   :  { %728 = vmatpush3.bf16.msra.mxu1 %v938_v1  ;;  %731 = vmatprep.mubr.msk.bf16.mxu1 %vm901_vm1, %v900_v0 }
 0x2dd   :  { %729 = vmatprep.subr.bf16.mxu1 %v900_v0 }
 0x2e0   :  { %730 = vmatpush3.bf16.msra.mxu1 %v941_v2 }
 0x2e1   :  { %743 = vmatprep.subr.bf16.mxu1 %v900_v0 }
 0x39b   :  { %v182_v29 = vpop.f32.mrf.mxu1 }
 0x39c   :  { %v188_v30 = vadd.f32 %v182_v29, %v140_v28 }
 0x39d   :  { %v717_v31 = vpop.f32.mrf.mxu1 }
 0x39e   :  { %786 = vtanh.f32 %v188_v30  ;;  %v189_v35 = vmul.f32 0.5, %v188_v30  ;;  %v356_v30 = vld [vmem:[#allocation3 + $0x20] sm:$0xff] }
 0x39f   :  { %v185_v32 = vpop.f32.mrf.mxu1 }
 0x3a0   :  { %788 = vtanh.f32 %v189_v35 }
 0x3a1   :  { %v718_v33 = vpop.f32.mrf.mxu1 }
 0x3ab   :  { %v787_v34 = vpop.eup %786 }
 0x3ac   :  { %196 = vrot.lane.b32.xlu1 %v787_v34, %s902_s0 }
 0x3ad   :  { %v789_v36 = vpop.eup %788 }
 0x3ae   :  { %v191_v37 = vmul.f32 0.5, %v789_v36 }
 0x3b0   :  { %v192_v38 = vadd.f32 0.5, %v191_v37 }
 0x3b2   :  { %v194_v41 = vmul.f32 %v192_v38, %v132_v22 }
 0x41e   :  { %v197_v39 = vpop.permute.xlu1 %196 }
 0x41f   :  { %v199_v40 = vmul.f32 %v197_v39, %v192_v38 }
 0x421   :  { %201 = vrot.lane.b32.xlu0 %v199_v40, %s902_s0 }
 0x493   :  { %v202_v42 = vpop.permute.xlu0 %201 }
 0x494   :  { %v204_v43 = vadd.f32 %v202_v42, %v194_v41 }
 0x496   :  { %790 = vtanh.f32 %v204_v43 }
 0x4a3   :  { %v791_v44 = vpop.eup %790 }
 0x4a4   :  { %207 = vrot.lane.b32.xlu1 %v791_v44, %s902_s0 }
 0x516   :  { %v208_v45 = vpop.permute.xlu1 %207 }
 0x517   :  { %v210_v46 = vmul.f32 %v208_v45, %v192_v38 }
 0x519   :  { %v213_v47 = vpack.c.bf16 %v210_v46, %v210_v46 }
 0x51b   :  { %215 = vrot.lane.b32.xlu0 %v213_v47, %s898_s19 }
 0x58d   :  { %v216_v48 = vpop.permute.xlu0 %215 }
 0x58e   :  { %724 = vmatmul.mubr.msk.bf16.vlgmr.msra.gmra.mxu0 %vm45_vm0, %v216_v48 }
 0x58f   :  { %736 = vmatpush3.bf16.msra.mxu0 %v938_v1  ;;  %739 = vmatprep.mubr.msk.bf16.mxu0 %vm901_vm1, %v900_v0 }
 0x590   :  { %737 = vmatprep.subr.bf16.mxu0 %v900_v0 }
 0x593   :  { %738 = vmatpush3.bf16.msra.mxu0 %v941_v2 }
 0x594   :  { %751 = vmatprep.subr.bf16.mxu0 %v900_v0 }
 0x64e   :  { %v254_v50 = vpop.f32.mrf.mxu0 }
 0x64f   :  { %v260_v51 = vadd.f32 %v254_v50, %v212_v49 }
 0x650   :  { %v725_v52 = vpop.f32.mrf.mxu0 }
 0x651   :  { %792 = vtanh.f32 %v260_v51  ;;  %v261_v56 = vmul.f32 0.5, %v260_v51  ;;  %v428_v51 = vld [vmem:[#allocation3 + $0x28] sm:$0xff] }
 0x652   :  { %v257_v53 = vpop.f32.mrf.mxu0 }
 0x653   :  { %794 = vtanh.f32 %v261_v56 }
 0x654   :  { %v726_v54 = vpop.f32.mrf.mxu0 }
 0x65e   :  { %v793_v55 = vpop.eup %792 }
 0x65f   :  { %268 = vrot.lane.b32.xlu1 %v793_v55, %s902_s0 }
 0x660   :  { %v795_v57 = vpop.eup %794 }
 0x661   :  { %v263_v58 = vmul.f32 0.5, %v795_v57 }
 0x663   :  { %v264_v59 = vadd.f32 0.5, %v263_v58 }
 0x665   :  { %v266_v62 = vmul.f32 %v264_v59, %v204_v43 }
 0x6d1   :  { %v269_v60 = vpop.permute.xlu1 %268 }
 0x6d2   :  { %v271_v61 = vmul.f32 %v269_v60, %v264_v59 }
 0x6d4   :  { %273 = vrot.lane.b32.xlu0 %v271_v61, %s902_s0 }
 0x746   :  { %v274_v63 = vpop.permute.xlu0 %273 }
 0x747   :  { %v276_v3 = vadd.f32 %v274_v63, %v266_v62 }
 0x749   :  { %796 = vtanh.f32 %v276_v3 }
 0x756   :  { %v797_v4 = vpop.eup %796 }
 0x757   :  { %279 = vrot.lane.b32.xlu1 %v797_v4, %s902_s0 }
 0x7c9   :  { %v280_v5 = vpop.permute.xlu1 %279 }
 0x7ca   :  { %v282_v6 = vmul.f32 %v280_v5, %v264_v59 }
 0x7cc   :  { %v285_v7 = vpack.c.bf16 %v282_v6, %v282_v6 }
 0x7ce   :  { %287 = vrot.lane.b32.xlu0 %v285_v7, %s898_s19 }
 0x840   :  { %v288_v8 = vpop.permute.xlu0 %287 }
 0x841   :  { %732 = vmatmul.mubr.msk.bf16.vlgmr.msra.gmra.mxu1 %vm45_vm0, %v288_v8  ;;  %v500_v8 = vld [vmem:[#allocation3 + $0x30] sm:$0xff] }
 0x842   :  { %744 = vmatpush3.bf16.msra.mxu1 %v938_v1  ;;  %747 = vmatprep.mubr.msk.bf16.mxu1 %vm901_vm1, %v900_v0 }
 0x843   :  { %745 = vmatprep.subr.bf16.mxu1 %v900_v0 }
 0x846   :  { %746 = vmatpush3.bf16.msra.mxu1 %v941_v2 }
 0x847   :  { %759 = vmatprep.subr.bf16.mxu1 %v900_v0 }
 0x901   :  { %v326_v10 = vpop.f32.mrf.mxu1 }
 0x902   :  { %v332_v11 = vadd.f32 %v326_v10, %v284_v9 }
 0x903   :  { %v733_v12 = vpop.f32.mrf.mxu1 }
 0x904   :  { %798 = vtanh.f32 %v332_v11  ;;  %v333_v16 = vmul.f32 0.5, %v332_v11 }
 0x905   :  { %v329_v13 = vpop.f32.mrf.mxu1 }
 0x906   :  { %800 = vtanh.f32 %v333_v16 }
 0x907   :  { %v734_v14 = vpop.f32.mrf.mxu1 }
 0x911   :  { %v799_v15 = vpop.eup %798 }
 0x912   :  { %340 = vrot.lane.b32.xlu1 %v799_v15, %s902_s0 }
 0x913   :  { %v801_v17 = vpop.eup %800 }
 0x914   :  { %v335_v18 = vmul.f32 0.5, %v801_v17 }
 0x916   :  { %v336_v19 = vadd.f32 0.5, %v335_v18 }
 0x918   :  { %v338_v22 = vmul.f32 %v336_v19, %v276_v3 }
 0x984   :  { %v341_v20 = vpop.permute.xlu1 %340 }
 0x985   :  { %v343_v21 = vmul.f32 %v341_v20, %v336_v19 }
 0x987   :  { %345 = vrot.lane.b32.xlu0 %v343_v21, %s902_s0 }
 0x9f9   :  { %v346_v23 = vpop.permute.xlu0 %345 }
 0x9fa   :  { %v348_v24 = vadd.f32 %v346_v23, %v338_v22 }
 0x9fc   :  { %802 = vtanh.f32 %v348_v24 }
 0xa09   :  { %v803_v25 = vpop.eup %802 }
 0xa0a   :  { %351 = vrot.lane.b32.xlu1 %v803_v25, %s902_s0 }
 0xa7c   :  { %v352_v26 = vpop.permute.xlu1 %351 }
 0xa7d   :  { %v354_v27 = vmul.f32 %v352_v26, %v336_v19 }
 0xa7f   :  { %v357_v28 = vpack.c.bf16 %v354_v27, %v354_v27 }
 0xa81   :  { %359 = vrot.lane.b32.xlu0 %v357_v28, %s898_s19 }
 0xaf3   :  { %v360_v29 = vpop.permute.xlu0 %359 }
 0xaf4   :  { %740 = vmatmul.mubr.msk.bf16.vlgmr.msra.gmra.mxu0 %vm45_vm0, %v360_v29  ;;  %v572_v29 = vld [vmem:[#allocation3 + $0x38] sm:$0xff] }
 0xaf5   :  { %752 = vmatpush3.bf16.msra.mxu0 %v938_v1  ;;  %755 = vmatprep.mubr.msk.bf16.mxu0 %vm901_vm1, %v900_v0 }
 0xaf6   :  { %753 = vmatprep.subr.bf16.mxu0 %v900_v0 }
 0xaf9   :  { %754 = vmatpush3.bf16.msra.mxu0 %v941_v2 }
 0xbb4   :  { %v398_v31 = vpop.f32.mrf.mxu0 }
 0xbb5   :  { %v404_v32 = vadd.f32 %v398_v31, %v356_v30 }
 0xbb6   :  { %v741_v33 = vpop.f32.mrf.mxu0 }
 0xbb7   :  { %804 = vtanh.f32 %v404_v32  ;;  %v405_v37 = vmul.f32 0.5, %v404_v32 }
 0xbb8   :  { %v401_v34 = vpop.f32.mrf.mxu0 }
 0xbb9   :  { %806 = vtanh.f32 %v405_v37 }
 0xbba   :  { %v742_v35 = vpop.f32.mrf.mxu0 }
 0xbc4   :  { %v805_v36 = vpop.eup %804 }
 0xbc5   :  { %412 = vrot.lane.b32.xlu1 %v805_v36, %s902_s0 }
 0xbc6   :  { %v807_v38 = vpop.eup %806 }
 0xbc7   :  { %v407_v39 = vmul.f32 0.5, %v807_v38 }
 0xbc9   :  { %v408_v40 = vadd.f32 0.5, %v407_v39 }
 0xbcb   :  { %v410_v43 = vmul.f32 %v408_v40, %v348_v24 }
 0xc37   :  { %v413_v41 = vpop.permute.xlu1 %412 }
 0xc38   :  { %v415_v42 = vmul.f32 %v413_v41, %v408_v40 }
 0xc3a   :  { %417 = vrot.lane.b32.xlu0 %v415_v42, %s902_s0 }
 0xcac   :  { %v418_v44 = vpop.permute.xlu0 %417 }
 0xcad   :  { %v420_v45 = vadd.f32 %v418_v44, %v410_v43 }
 0xcaf   :  { %808 = vtanh.f32 %v420_v45 }
 0xcbc   :  { %v809_v46 = vpop.eup %808 }
 0xcbd   :  { %423 = vrot.lane.b32.xlu1 %v809_v46, %s902_s0 }
 0xd2f   :  { %v424_v47 = vpop.permute.xlu1 %423 }
 0xd30   :  { %v426_v48 = vmul.f32 %v424_v47, %v408_v40 }
 0xd32   :  { %v429_v49 = vpack.c.bf16 %v426_v48, %v426_v48 }
 0xd34   :  { %431 = vrot.lane.b32.xlu0 %v429_v49, %s898_s19 }
 0xda6   :  { %v432_v50 = vpop.permute.xlu0 %431 }
 0xda7   :  { %748 = vmatmul.mubr.msk.bf16.vlgmr.msra.gmra.mxu1 %vm45_vm0, %v432_v50 }
 0xda8   :  { %760 = vmatpush3.bf16.msra.mxu1 %v938_v1  ;;  %763 = vmatprep.mubr.msk.bf16.mxu1 %vm901_vm1, %v900_v0 }
 0xda9   :  { %761 = vmatprep.subr.bf16.mxu1 %v900_v0 }
 0xdac   :  { %762 = vmatpush3.bf16.msra.mxu1 %v941_v2 }
 0xe67   :  { %v470_v52 = vpop.f32.mrf.mxu1 }
 0xe68   :  { %v476_v53 = vadd.f32 %v470_v52, %v428_v51 }
 0xe69   :  { %v749_v54 = vpop.f32.mrf.mxu1 }
 0xe6a   :  { %810 = vtanh.f32 %v476_v53  ;;  %v477_v58 = vmul.f32 0.5, %v476_v53 }
 0xe6b   :  { %v473_v55 = vpop.f32.mrf.mxu1 }
 0xe6c   :  { %812 = vtanh.f32 %v477_v58 }
 0xe6d   :  { %v750_v56 = vpop.f32.mrf.mxu1 }
 0xe77   :  { %v811_v57 = vpop.eup %810 }
 0xe78   :  { %484 = vrot.lane.b32.xlu1 %v811_v57, %s902_s0 }
 0xe79   :  { %v813_v1 = vpop.eup %812 }
 0xe7a   :  { %v479_v59 = vmul.f32 0.5, %v813_v1 }
 0xe7c   :  { %v480_v60 = vadd.f32 0.5, %v479_v59 }
 0xe7e   :  { %v482_v0 = vmul.f32 %v480_v60, %v420_v45 }
 0xeea   :  { %v485_v61 = vpop.permute.xlu1 %484 }
 0xeeb   :  { %v487_v62 = vmul.f32 %v485_v61, %v480_v60 }
 0xeed   :  { %489 = vrot.lane.b32.xlu0 %v487_v62, %s902_s0 }
 0xf5f   :  { %v490_v2 = vpop.permute.xlu0 %489 }
 0xf60   :  { %v492_v63 = vadd.f32 %v490_v2, %v482_v0 }
 0xf62   :  { %814 = vtanh.f32 %v492_v63 }
 0xf6f   :  { %v815_v3 = vpop.eup %814 }
 0xf70   :  { %495 = vrot.lane.b32.xlu1 %v815_v3, %s902_s0 }
 0xfe2   :  { %v496_v4 = vpop.permute.xlu1 %495 }
 0xfe3   :  { %v498_v5 = vmul.f32 %v496_v4, %v480_v60 }
 0xfe5   :  { %v501_v6 = vpack.c.bf16 %v498_v5, %v498_v5 }
 0xfe7   :  { %503 = vrot.lane.b32.xlu0 %v501_v6, %s898_s19 }
0x1059   :  { %v504_v7 = vpop.permute.xlu0 %503 }
0x105a   :  { %756 = vmatmul.mubr.msk.bf16.vlgmr.msra.gmra.mxu0 %vm45_vm0, %v504_v7 }
0x111a   :  { %v542_v9 = vpop.f32.mrf.mxu0 }
0x111b   :  { %v548_v10 = vadd.f32 %v542_v9, %v500_v8 }
0x111c   :  { %v757_v11 = vpop.f32.mrf.mxu0 }
0x111d   :  { %816 = vtanh.f32 %v548_v10  ;;  %v549_v15 = vmul.f32 0.5, %v548_v10 }
0x111e   :  { %v545_v12 = vpop.f32.mrf.mxu0 }
0x111f   :  { %818 = vtanh.f32 %v549_v15 }
0x1120   :  { %v758_v13 = vpop.f32.mrf.mxu0 }
0x112a   :  { %v817_v14 = vpop.eup %816 }
0x112b   :  { %556 = vrot.lane.b32.xlu1 %v817_v14, %s902_s0 }
0x112c   :  { %v819_v16 = vpop.eup %818 }
0x112d   :  { %v551_v17 = vmul.f32 0.5, %v819_v16 }
0x112f   :  { %v552_v18 = vadd.f32 0.5, %v551_v17 }
0x1131   :  { %v554_v21 = vmul.f32 %v552_v18, %v492_v63 }
0x119d   :  { %v557_v19 = vpop.permute.xlu1 %556 }
0x119e   :  { %v559_v20 = vmul.f32 %v557_v19, %v552_v18 }
0x11a0   :  { %561 = vrot.lane.b32.xlu0 %v559_v20, %s902_s0 }
0x1212   :  { %v562_v22 = vpop.permute.xlu0 %561 }
0x1213   :  { %v564_v23 = vadd.f32 %v562_v22, %v554_v21 }
0x1215   :  { %820 = vtanh.f32 %v564_v23 }
0x1222   :  { %v821_v24 = vpop.eup %820 }
0x1223   :  { %567 = vrot.lane.b32.xlu1 %v821_v24, %s902_s0 }
0x1295   :  { %v568_v25 = vpop.permute.xlu1 %567 }
0x1296   :  { %v570_v26 = vmul.f32 %v568_v25, %v552_v18 }
0x1298   :  { %v573_v27 = vpack.c.bf16 %v570_v26, %v570_v26 }
0x129a   :  { %575 = vrot.lane.b32.xlu0 %v573_v27, %s898_s19 }
0x130c   :  { %v576_v28 = vpop.permute.xlu0 %575 }
0x130d   :  { %764 = vmatmul.mubr.msk.bf16.vlgmr.msra.gmra.mxu1 %vm45_vm0, %v576_v28 }
0x13cd   :  { %v614_v30 = vpop.f32.mrf.mxu1 }
0x13ce   :  { %v620_v31 = vadd.f32 %v614_v30, %v572_v29 }
0x13cf   :  { %v765_v32 = vpop.f32.mrf.mxu1 }
0x13d0   :  { %822 = vtanh.f32 %v620_v31  ;;  %v621_v36 = vmul.f32 0.5, %v620_v31 }
0x13d1   :  { %v617_v33 = vpop.f32.mrf.mxu1 }
0x13d2   :  { %824 = vtanh.f32 %v621_v36 }
0x13d3   :  { %v766_v34 = vpop.f32.mrf.mxu1 }
0x13dd   :  { %v823_v35 = vpop.eup %822 }
0x13de   :  { %628 = vrot.lane.b32.xlu1 %v823_v35, %s902_s0 }
0x13df   :  { %v825_v37 = vpop.eup %824 }
0x13e0   :  { %v623_v38 = vmul.f32 0.5, %v825_v37 }
0x13e2   :  { %v624_v39 = vadd.f32 0.5, %v623_v38 }
0x13e4   :  { %v626_v42 = vmul.f32 %v624_v39, %v564_v23 }
0x1450   :  { %v629_v40 = vpop.permute.xlu1 %628 }
0x1451   :  { %v631_v41 = vmul.f32 %v629_v40, %v624_v39 }
0x1453   :  { %633 = vrot.lane.b32.xlu0 %v631_v41, %s902_s0 }
0x14c5   :  { %v634_v43 = vpop.permute.xlu0 %633 }
0x14c6   :  { %v636_v44 = vadd.f32 %v634_v43, %v626_v42 }
0x14c8   :  { %826 = vtanh.f32 %v636_v44 }
0x14d5   :  { %v827_v45 = vpop.eup %826 }
0x14d6   :  { %639 = vrot.lane.b32.xlu1 %v827_v45, %s902_s0 }
0x14da   :  { %649 = vrot.lane.b32.xlu1 %v636_v44, %s903_s1 }
0x1548   :  { %v640_v46 = vpop.permute.xlu1 %639 }
0x1549   :  { %v642_v47 = vmul.f32 %v640_v46, %v624_v39 }
0x154b   :  { %644 = vrot.lane.b32.xlu0 %v642_v47, %s898_s19 }
0x154c   :  { %v650_v48 = vpop.permute.xlu1 %649 }
0x154d   :  { %652 = vst.msk [vmem:[#allocation2] sm:$0xff] %vm45_vm0, %v650_v48 }
0x15bd   :  { %v645_v49 = vpop.permute.xlu0 %644 }
0x15be   :  { %647 = vst.msk [vmem:[#allocation8] sm:$0xff] %vm45_vm0, %v645_v49 }
0x15bf   :  { %879 = shalt.err (!%p876_p0)
}
0x15c0   :  { %662 = dma.vmem_to_hbm [thread:$0]  %s660_s24, 128, %s1032_s2, [#allocation5]  }
0x15c1   :  { %892 = dma.done.wait [#allocation5], 128  }
0x15c2   :  { %893 = vsyncadd [#allocation5], 4294967168 }
0x15c3   :  { %666 = vsyncpa [#allocation4], 1 }
0x15c4   :  { %667 = vsyncpa [#allocation7], 1 }
0x15c5   :  { %668 = vsyncpa [#allocation5], 1 }

</bundles_post_ra>
